<compile_context>
chip_gen: v7x
topology: tpu7x:2x2x1
jax: 0.10.0
libtpu: 0.0.40
codegen_flags: <defaults>
</compile_context>

<pallas_src>
import functools

import jax
import jax.numpy as jnp
from jax.experimental import pallas as pl
from jax.experimental.pallas import tpu as pltpu


def _make_selfens_kernel(confidence_thresh, n_rows, tile_n, steps_per_core):
    """Kernel over [C, tile_n] tiles: classes on sublanes, batch on lanes."""
    thresh = float(confidence_thresh)  # trace-time constant (no SMEM operand)
    inv_n = 1.0 / float(n_rows)

    def kernel(stu_ref, tea_ref, out_ref):
        c = pl.program_id(0)   # partial-sum / TensorCore index ("parallel")
        i = pl.program_id(1)   # batch-tile step ("arbitrary" reduction axis)

        @pl.when(i == 0)
        def _():
            out_ref[...] = jnp.zeros_like(out_ref)

        # Validity mask from the *logical* (unclamped) block position; the
        # clamped duplicate blocks and the ragged tail are fully masked.
        row0 = (c * steps_per_core + i) * tile_n
        lane = jax.lax.broadcasted_iota(jnp.int32, (1, tile_n), 1)
        valid = (row0 + lane) < n_rows                                  # (1, tile_n)

        # Zero out invalid columns BEFORE any nonlinearity (garbage -> NaN-safe).
        stu = jnp.where(valid, stu_ref[...].astype(jnp.float32), 0.0)  # (C, tile_n)
        tea = jnp.where(valid, tea_ref[...].astype(jnp.float32), 0.0)

        # softmax along the class axis (axis 0 == sublanes == PyTorch dim=1)
        stu_e = jnp.exp(stu - jnp.max(stu, axis=0, keepdims=True))
        stu_sm = stu_e * pl.reciprocal(jnp.sum(stu_e, axis=0, keepdims=True),
                                       approx=False)
        tea_e = jnp.exp(tea - jnp.max(tea, axis=0, keepdims=True))
        tea_sm = tea_e * pl.reciprocal(jnp.sum(tea_e, axis=0, keepdims=True),
                                       approx=False)

        # teacher confidence + mask  (torch.max(tea_out, 1)[0] > thresh)
        conf_tea = jnp.max(tea_sm, axis=0, keepdims=True)               # (1, tile_n)
        conf_mask = ((conf_tea > thresh) & valid).astype(jnp.float32)

        # squared difference, mean over classes, masked; accumulate batch sum
        d = stu_sm - tea_sm
        row_loss = jnp.mean(d * d, axis=0, keepdims=True)               # (1, tile_n)
        out_ref[...] += jnp.sum(row_loss * conf_mask).reshape(1, 1)

        @pl.when(i == pl.num_programs(1) - 1)
        def _():
            # masked rows count in the denominator, matching torch.mean
            out_ref[...] = out_ref[...] * inv_n

    return kernel


def _pick_tile_n(n_classes, itemsize):
    # 2 operands x 2 pipeline buffers of (C, tile_n) must stay well under the
    # scoped VMEM limit (32 MiB set below; safe on v7x's 64 MiB physical VMEM).
    budget = 16 * 1024 * 1024
    per_col = 2 * 2 * n_classes * itemsize
    t = (budget // per_col) // 128 * 128
    return int(max(128, min(2048, t)))


def self_ens_loss(stu_logits_out, tea_logits_out, confidence_thresh,
                  n_classes=None, tile_n=None):
    """Pallas TPU forward of SelfEnsLoss. `n_classes` is unused (as in PyTorch)."""
    # TODO(synk): if confidence_thresh must be a runtime (traced) value, pass it
    # via PrefetchScalarGridSpec(num_scalar_prefetch=1) instead of baking it in.
    del n_classes
    N, C = stu_logits_out.shape
    itemsize = jnp.dtype(stu_logits_out.dtype).itemsize

    if tile_n is None:
        tile_n = _pick_tile_n(C, itemsize)
    if N <= tile_n:
        tile_n = N                                  # single full-extent block

    n_blocks = pl.cdiv(N, tile_n)
    num_partials = min(2, n_blocks)                 # 2 TCs on v7x; 1 otherwise
    steps_per_core = pl.cdiv(n_blocks, num_partials)
    max_blk = n_blocks - 1

    # Lane-dense layout: classes -> sublanes, batch -> lanes.
    # (Callers that already hold class-major [C, N] logits can skip this.)
    stu_t = jnp.transpose(stu_logits_out)           # (C, N)
    tea_t = jnp.transpose(tea_logits_out)           # (C, N)

    def in_map(c, i):
        blk = c * steps_per_core + i
        return (0, jnp.minimum(blk, max_blk))       # clamp padded blocks

    kernel = _make_selfens_kernel(confidence_thresh, N, tile_n, steps_per_core)

    partials = pl.pallas_call(
        kernel,
        out_shape=jax.ShapeDtypeStruct((num_partials, 1), jnp.float32),
        grid_spec=pltpu.PrefetchScalarGridSpec(
            num_scalar_prefetch=0,
            grid=(num_partials, steps_per_core),
            in_specs=[
                pl.BlockSpec((C, tile_n), in_map),   # student logits [C, N]
                pl.BlockSpec((C, tile_n), in_map),   # teacher logits [C, N]
            ],
            out_specs=pl.BlockSpec((1, 1), lambda c, i: (c, 0)),
        ),
        compiler_params=pltpu.CompilerParams(
            dimension_semantics=("parallel", "arbitrary"),
            vmem_limit_bytes=32 * 1024 * 1024,
        ),
    )(stu_t, tea_t)

    return jnp.sum(partials)                         # add per-core partial sums


def _reference(stu, tea, thresh):
    stu_sm = jax.nn.softmax(stu, axis=1)
    tea_sm = jax.nn.softmax(tea, axis=1)
    conf_tea = jnp.max(tea_sm, axis=1)
    conf_mask = (conf_tea > thresh).astype(jnp.float32)
    d = stu_sm - tea_sm
    aug = jnp.mean(d * d, axis=1) * conf_mask
    return jnp.mean(aug)


if __name__ == "__main__":
    key = jax.random.PRNGKey(0)
    k1, k2, k3, k4 = jax.random.split(key, 4)
    confidence_thresh = 0.5

    # --- canonical small case (f32), matching the module's expected shapes ---
    N, C = 16, 8
    stu_logits = jax.random.normal(k1, (N, C), dtype=jnp.float32)
    tea_logits = jax.random.normal(k2, (N, C), dtype=jnp.float32)

    loss = self_ens_loss(stu_logits, tea_logits, confidence_thresh, n_classes=C)
    loss = jax.block_until_ready(loss)
    ref = _reference(stu_logits, tea_logits, confidence_thresh)
    assert jnp.allclose(loss, ref, atol=1e-6, rtol=1e-5), (loss, ref)

    # --- ragged batch, multi-tile, 2 partial sums, bf16 logits in HBM ---
    N2, C2 = 300, 8
    stu2 = jax.random.normal(k3, (N2, C2), dtype=jnp.float32).astype(jnp.bfloat16)
    tea2 = jax.random.normal(k4, (N2, C2), dtype=jnp.float32).astype(jnp.bfloat16)
    loss2 = self_ens_loss(stu2, tea2, confidence_thresh, n_classes=C2, tile_n=128)
    loss2 = jax.block_until_ready(loss2)
    ref2 = _reference(stu2.astype(jnp.float32), tea2.astype(jnp.float32),
                      confidence_thresh)
    assert jnp.allclose(loss2, ref2, atol=1e-6, rtol=1e-5), (loss2, ref2)

    # mimic the PyTorch return signature: (loss, ('05. self ensemble loss: ', value))
    _result = (loss, ("05. self ensemble loss: ", jax.device_get(loss)))

    print("KERNEL_OK")
</pallas_src>

<mosaic_0001>
module attributes {stable_mosaic.version = 11 : i64} {
  func.func @kernel(%arg0: i32, %arg1: i32, %arg2: memref<8x16xf32, #tpu.memory_space<vmem>>, %arg3: memref<8x16xf32, #tpu.memory_space<vmem>>, %arg4: memref<1x1xf32, #tpu.memory_space<vmem>>) attributes {dimension_semantics = [#tpu.dimension_semantics<parallel>, #tpu.dimension_semantics<arbitrary>], iteration_bounds = array<i64: 1, 1>, scalar_prefetch = 0 : i64, scratch_operands = 0 : i64, tpu.core_type = #tpu.core_type<tc>, window_params = [{transform_indices = @transform_0, window_bounds = array<i64: 8, 16>}, {transform_indices = @transform_1, window_bounds = array<i64: 8, 16>}, {transform_indices = @transform_2, window_bounds = array<i64: 1, 1>}]} {
    %c0_i32 = arith.constant 0 : i32
    %0 = arith.cmpi eq, %arg1, %c0_i32 : i32
    %1 = arith.extui %0 : i1 to i32
    %c0_i32_0 = arith.constant 0 : i32
    %2 = arith.cmpi ne, %1, %c0_i32_0 : i32
    scf.if %2 {
      %cst_21 = arith.constant 0.000000e+00 : f32
      %66 = vector.broadcast %cst_21 : f32 to vector<1x1xf32>
      %c0_22 = arith.constant 0 : index
      %c0_23 = arith.constant 0 : index
      %67 = vector.load %arg4[%c0_22, %c0_23] : memref<1x1xf32, #tpu.memory_space<vmem>>, vector<1x1xf32>
      tpu.vector_store %arg4[%c0_22, %c0_23], %66 {strides = array<i32>} : memref<1x1xf32, #tpu.memory_space<vmem>>, vector<1x1xf32>,
    } else {
    }
    %c1_i32 = arith.constant 1 : i32
    %3 = arith.muli %arg0, %c1_i32 : i32
    %4 = arith.addi %3, %arg1 : i32
    %c16_i32 = arith.constant 16 : i32
    %5 = arith.muli %4, %c16_i32 : i32
    %6 = tpu.iota {dimensions = array<i32: 1>} : vector<1x16xi32>
    %7 = vector.broadcast %5 : i32 to vector<1x16xi32>
    %8 = arith.addi %7, %6 : vector<1x16xi32>
    %c16_i32_1 = arith.constant 16 : i32
    %9 = vector.broadcast %c16_i32_1 : i32 to vector<1x16xi32>
    %10 = arith.cmpi slt, %8, %9 : vector<1x16xi32>
    %c0 = arith.constant 0 : index
    %c0_2 = arith.constant 0 : index
    %11 = vector.load %arg2[%c0, %c0_2] : memref<8x16xf32, #tpu.memory_space<vmem>>, vector<8x16xf32>
    %cst = arith.constant 0.000000e+00 : f32
    %12 = vector.shape_cast %10 : vector<1x16xi1> to vector<1x16xi1>
    %13 = vector.broadcast %12 : vector<1x16xi1> to vector<8x16xi1>
    %14 = vector.broadcast %cst : f32 to vector<8x16xf32>
    %15 = arith.select %13, %11, %14 : vector<8x16xi1>, vector<8x16xf32>
    %c0_3 = arith.constant 0 : index
    %c0_4 = arith.constant 0 : index
    %16 = vector.load %arg3[%c0_3, %c0_4] : memref<8x16xf32, #tpu.memory_space<vmem>>, vector<8x16xf32>
    %cst_5 = arith.constant 0.000000e+00 : f32
    %17 = vector.shape_cast %10 : vector<1x16xi1> to vector<1x16xi1>
    %18 = vector.broadcast %17 : vector<1x16xi1> to vector<8x16xi1>
    %19 = vector.broadcast %cst_5 : f32 to vector<8x16xf32>
    %20 = arith.select %18, %16, %19 : vector<8x16xi1>, vector<8x16xf32>
    %cst_6 = arith.constant dense<0xFF800000> : vector<16xf32>
    %21 = vector.multi_reduction <maximumf>, %15, %cst_6 [0] : vector<8x16xf32> to vector<16xf32>
    %22 = vector.shape_cast %21 : vector<16xf32> to vector<1x16xf32>
    %23 = vector.broadcast %22 : vector<1x16xf32> to vector<8x16xf32>
    %24 = arith.subf %15, %23 : vector<8x16xf32>
    %25 = math.exp %24 : vector<8x16xf32>
    %cst_7 = arith.constant dense<0.000000e+00> : vector<16xf32>
    %26 = vector.multi_reduction <add>, %25, %cst_7 [0] : vector<8x16xf32> to vector<16xf32>
    %27 = vector.shape_cast %26 : vector<16xf32> to vector<1x16xf32>
    %28 = tpu.reciprocal %27 : vector<1x16xf32> -> vector<1x16xf32>
    %29 = vector.broadcast %28 : vector<1x16xf32> to vector<8x16xf32>
    %30 = arith.mulf %25, %29 : vector<8x16xf32>
    %cst_8 = arith.constant dense<0xFF800000> : vector<16xf32>
    %31 = vector.multi_reduction <maximumf>, %20, %cst_8 [0] : vector<8x16xf32> to vector<16xf32>
    %32 = vector.shape_cast %31 : vector<16xf32> to vector<1x16xf32>
    %33 = vector.broadcast %32 : vector<1x16xf32> to vector<8x16xf32>
    %34 = arith.subf %20, %33 : vector<8x16xf32>
    %35 = math.exp %34 : vector<8x16xf32>
    %cst_9 = arith.constant dense<0.000000e+00> : vector<16xf32>
    %36 = vector.multi_reduction <add>, %35, %cst_9 [0] : vector<8x16xf32> to vector<16xf32>
    %37 = vector.shape_cast %36 : vector<16xf32> to vector<1x16xf32>
    %38 = tpu.reciprocal %37 : vector<1x16xf32> -> vector<1x16xf32>
    %39 = vector.broadcast %38 : vector<1x16xf32> to vector<8x16xf32>
    %40 = arith.mulf %35, %39 : vector<8x16xf32>
    %cst_10 = arith.constant dense<0xFF800000> : vector<16xf32>
    %41 = vector.multi_reduction <maximumf>, %40, %cst_10 [0] : vector<8x16xf32> to vector<16xf32>
    %42 = vector.shape_cast %41 : vector<16xf32> to vector<1x16xf32>
    %cst_11 = arith.constant 5.000000e-01 : f32
    %43 = vector.broadcast %cst_11 : f32 to vector<1x16xf32>
    %44 = arith.cmpf ogt, %42, %43 : vector<1x16xf32>
    %45 = arith.andi %44, %10 : vector<1x16xi1>
    %46 = arith.extui %45 : vector<1x16xi1> to vector<1x16xi32>
    %47 = arith.sitofp %46 : vector<1x16xi32> to vector<1x16xf32>
    %48 = arith.subf %30, %40 : vector<8x16xf32>
    %49 = arith.mulf %48, %48 : vector<8x16xf32>
    %cst_12 = arith.constant dense<0.000000e+00> : vector<16xf32>
    %50 = vector.multi_reduction <add>, %49, %cst_12 [0] : vector<8x16xf32> to vector<16xf32>
    %51 = vector.shape_cast %50 : vector<16xf32> to vector<1x16xf32>
    %cst_13 = arith.constant 8.000000e+00 : f32
    %52 = vector.broadcast %cst_13 : f32 to vector<1x16xf32>
    %53 = arith.divf %51, %52 : vector<1x16xf32>
    %c0_14 = arith.constant 0 : index
    %c0_15 = arith.constant 0 : index
    %54 = vector.load %arg4[%c0_14, %c0_15] : memref<1x1xf32, #tpu.memory_space<vmem>>, vector<1x1xf32>
    %55 = arith.mulf %53, %47 : vector<1x16xf32>
    %56 = vector.shape_cast %55 : vector<1x16xf32> to vector<1x1x16xf32>
    %cst_16 = arith.constant dense<0.000000e+00> : vector<1xf32>
    %57 = vector.multi_reduction <add>, %56, %cst_16 [1, 2] : vector<1x1x16xf32> to vector<1xf32>
    %58 = vector.shape_cast %57 : vector<1xf32> to vector<1x1x1xf32>
    %59 = vector.extract %58[0, 0, 0] : f32 from vector<1x1x1xf32>
    %60 = vector.broadcast %59 : f32 to vector<1x1xf32>
    %61 = arith.addf %54, %60 : vector<1x1xf32>
    %c0_17 = arith.constant 0 : index
    %c0_18 = arith.constant 0 : index
    %62 = vector.load %arg4[%c0_17, %c0_18] : memref<1x1xf32, #tpu.memory_space<vmem>>, vector<1x1xf32>
    tpu.vector_store %arg4[%c0_17, %c0_18], %61 {strides = array<i32>} : memref<1x1xf32, #tpu.memory_space<vmem>>, vector<1x1xf32>,
    %c0_i32_19 = arith.constant 0 : i32
    %63 = arith.cmpi eq, %arg1, %c0_i32_19 : i32
    %64 = arith.extui %63 : i1 to i32
    %c0_i32_20 = arith.constant 0 : i32
    %65 = arith.cmpi ne, %64, %c0_i32_20 : i32
    scf.if %65 {
      %c0_21 = arith.constant 0 : index
      %c0_22 = arith.constant 0 : index
      %66 = vector.load %arg4[%c0_21, %c0_22] : memref<1x1xf32, #tpu.memory_space<vmem>>, vector<1x1xf32>
      %cst_23 = arith.constant 6.250000e-02 : f32
      %67 = vector.broadcast %cst_23 : f32 to vector<1x1xf32>
      %68 = arith.mulf %66, %67 : vector<1x1xf32>
      %c0_24 = arith.constant 0 : index
      %c0_25 = arith.constant 0 : index
      %69 = vector.load %arg4[%c0_24, %c0_25] : memref<1x1xf32, #tpu.memory_space<vmem>>, vector<1x1xf32>
      tpu.vector_store %arg4[%c0_24, %c0_25], %68 {strides = array<i32>} : memref<1x1xf32, #tpu.memory_space<vmem>>, vector<1x1xf32>,
    } else {
    }
    return
  }
  func.func @transform_0(%arg0: i32, %arg1: i32) -> (i32, i32) {
    %c1_i32 = arith.constant 1 : i32
    %0 = arith.muli %arg0, %c1_i32 : i32
    %1 = arith.addi %0, %arg1 : i32
    %c0_i32 = arith.constant 0 : i32
    %2 = arith.minsi %1, %c0_i32 : i32
    %c0_i32_0 = arith.constant 0 : i32
    %c0_i32_1 = arith.constant 0 : i32
    return %c0_i32_0, %2 : i32, i32
  }
  func.func @transform_1(%arg0: i32, %arg1: i32) -> (i32, i32) {
    %c1_i32 = arith.constant 1 : i32
    %0 = arith.muli %arg0, %c1_i32 : i32
    %1 = arith.addi %0, %arg1 : i32
    %c0_i32 = arith.constant 0 : i32
    %2 = arith.minsi %1, %c0_i32 : i32
    %c0_i32_0 = arith.constant 0 : i32
    %c0_i32_1 = arith.constant 0 : i32
    return %c0_i32_0, %2 : i32, i32
  }
  func.func @transform_2(%arg0: i32, %arg1: i32) -> (i32, i32) {
    %c0_i32 = arith.constant 0 : i32
    %c0_i32_0 = arith.constant 0 : i32
    return %arg0, %c0_i32 : i32, i32
  }
}

</mosaic_0001>

<bundles_post_ra>
// kernel: tpu_custom_call.1
= control target key start
LH: loop header
LB: loop body
LE: loop exit
PB: predicated region body
PF: predicated region fallthrough
CT: control target
= control target key end

     0   :  { %7 = vsyncpa [#allocation3], 0  ;;  %s337_s0 = inlined_call_operand.hbm [shape: f32[8,16], index: 0, kind: input, shape index: {}]   ;;  %s338_s1 = inlined_call_operand.hbm [shape: f32[8,16], index: 1, kind: input, shape index: {}]   ;;  %s339_s2 = inlined_call_operand.hbm [shape: f32[1,1], index: 2, kind: output, shape index: {}]  }
   0x1   :  { %8 = vsyncpa [#allocation6], 0 }
   0x2   :  { %9 = vsyncpa [#allocation4], 0  ;;  %s262_s9 = smov [#allocation2]   ;;  %s263_s11 = smov [#allocation5]  }
   0x3   :  { %s21_s10 = sshll.u32 %s262_s9, 4  ;;  %s36_s12 = sshll.u32 %s263_s11, 4  ;;  %s22_s10 = int_to_ptr.vmem [resolvable:$true] %s21_s10  ;;  %s37_s12 = int_to_ptr.vmem [resolvable:$true] %s36_s12 }
   0x4   :  { %s190_s15 = scalar_lea.hbm %s337_s0, 128 }
   0x5   :  { %p191_p0 = scmp.ne.s32.totalorder %s337_s0, %s190_s15  ;;  %p194_p1 = scmp.lt.u32.totalorder %s190_s15, %s337_s0 }
   0x7   :  { %p196_p2 = pnand %p194_p1, %p191_p0 }
   0x9   :  { %199 = shalt.err (!%p196_p2)
}
   0xa   :  { %s200_s20 = scalar_lea.vmem %s22_s10, 128  ;;  %p205_p4 = scmp.lt.s32.totalorder %s22_s10, %s22_s10 }
   0xb   :  { %p201_p3 = scmp.ne.s32.totalorder %s22_s10, %s200_s20  ;;  %p206_p5 = scmp.lt.s32.totalorder %s200_s20, %s200_s20 }
   0xd   :  { %p207_p6 = por %p206_p5, %p205_p4 }
   0xf   :  { %p208_p7 = pnand %p207_p6, %p201_p3 }
  0x11   :  { %211 = shalt.err (!%p208_p7)
}
  0x12   :  { %24 = dma.hbm_to_vmem [thread:$0]  %s337_s0, 128, %s22_s10, [#allocation3]  }
  0x13   :  { %s212_s25 = scalar_lea.hbm %s338_s1, 128 }
  0x14   :  { %p213_p8 = scmp.ne.s32.totalorder %s338_s1, %s212_s25  ;;  %p216_p9 = scmp.lt.u32.totalorder %s212_s25, %s338_s1 }
  0x16   :  { %p218_p10 = pnand %p216_p9, %p213_p8 }
  0x18   :  { %221 = shalt.err (!%p218_p10)
}
  0x19   :  { %s222_s30 = scalar_lea.vmem %s37_s12, 128  ;;  %p227_p12 = scmp.lt.s32.totalorder %s37_s12, %s37_s12 }
  0x1a   :  { %p223_p11 = scmp.ne.s32.totalorder %s37_s12, %s222_s30  ;;  %p228_p13 = scmp.lt.s32.totalorder %s222_s30, %s222_s30 }
  0x1c   :  { %p229_p0 = por %p228_p13, %p227_p12 }
  0x1e   :  { %p230_p1 = pnand %p229_p0, %p223_p11 }
  0x20   :  { %233 = shalt.err (!%p230_p1)
}
  0x21   :  { %39 = dma.hbm_to_vmem [thread:$0]  %s338_s1, 128, %s37_s12, [#allocation6]  }
  0x22   :  { %256 = dma.done.wait [#allocation3], 128  }
  0x23   :  { %257 = vsyncadd [#allocation3], 4294967168 }
  0x24   :  { %258 = dma.done.wait [#allocation6], 128  }
  0x25   :  { %259 = vsyncadd [#allocation6], 4294967168  ;;  %vm56_vm0 = vcmask 0   ;;  %v60_v0 = vlaneseq  ;;  %v264_v1 = vmov 0.0   ;;  %vm71_vm2 = vcmask 130048   ;;  %v65_v3 = vld [vmem:[#allocation2] sm:$0xff] }
  0x26   :  { %57 = vst.msk [vmem:[#allocation7] sm:$0x1] %vm56_vm0, %v264_v1  ;;  %v69_v4 = vld [vmem:[#allocation5] sm:$0xff]  ;;  %vm134_vm5 = vcmask 122880   ;;  %s265_s4 = smov [#allocation7]  }
  0x27   :  { %v307_v2 = vand.u32 127, %v60_v0  ;;  %s161_s5 = sshll.u32 %s265_s4, 4  ;;  %s162_s5 = int_to_ptr.vmem [resolvable:$true] %s161_s5 }
  0x28   :  { %s234_s6 = scalar_lea.vmem %s162_s5, 16  ;;  %s238_s7 = scalar_lea.vmem %s162_s5, 32 }
  0x29   :  { %vm64_vm1 = vcmp.lt.s32.totalorder %v307_v2, 16  ;;  %p235_p2 = scmp.ne.s32.totalorder %s162_s5, %s234_s6  ;;  %p239_p3 = scmp.lt.s32.totalorder %s162_s5, %s162_s5 }
  0x2a   :  { %v68_v5 = vsel %vm64_vm1, %v65_v3, 0.0  ;;  %v70_v6 = vsel %vm64_vm1, %v69_v4, 0.0  ;;  %p240_p4 = scmp.lt.s32.totalorder %s238_s7, %s234_s6 }
  0x2b   :  { %v72_v7 = vsel %vm71_vm2, %v68_v5, -inf  ;;  %v91_v8 = vsel %vm71_vm2, %v70_v6, -inf }
  0x2c   :  { %v73_v9 = vrot.slane %v72_v7, 4  ;;  %v92_v10 = vrot.slane %v91_v8, 4  ;;  %p241_p5 = por %p240_p4, %p239_p3 }
  0x2e   :  { %v74_v11 = vmax.f32 %v72_v7, %v73_v9  ;;  %v93_v12 = vmax.f32 %v91_v8, %v92_v10  ;;  %v132_v10 = vld [vmem:[#allocation7] sm:$0x1]  ;;  %p242_p6 = pnand %p241_p5, %p235_p2 }
  0x30   :  { %v75_v13 = vrot.slane %v74_v11, 2  ;;  %v94_v14 = vrot.slane %v93_v12, 2 }
  0x32   :  { %v76_v15 = vmax.f32 %v74_v11, %v75_v13  ;;  %v95_v16 = vmax.f32 %v93_v12, %v94_v14 }
  0x34   :  { %v77_v17 = vrot.slane %v76_v15, 1  ;;  %v96_v18 = vrot.slane %v95_v16, 1 }
  0x36   :  { %v78_v19 = vmax.f32 %v76_v15, %v77_v17  ;;  %v97_v20 = vmax.f32 %v95_v16, %v96_v18 }
  0x38   :  { %v79_v21 = vsub.f32 %v68_v5, %v78_v19  ;;  %v98_v22 = vsub.f32 %v70_v6, %v97_v20 }
  0x3a   :  { %v80_v23 = vmul.f32 1.442695, %v79_v21  ;;  %v99_v24 = vmul.f32 1.442695, %v98_v22 }
  0x3c   :  { %182 = vpow2.f32 %v80_v23 }
  0x3d   :  { %184 = vpow2.f32 %v99_v24 }
  0x46   :  { %v183_v25 = vpop.eup %182 }
  0x47   :  { %v185_v26 = vpop.eup %184  ;;  %v82_v27 = vsel %vm71_vm2, %v183_v25, 0.0 }
  0x48   :  { %v83_v28 = vrot.slane %v82_v27, 4  ;;  %v101_v29 = vsel %vm71_vm2, %v185_v26, 0.0 }
  0x49   :  { %v102_v30 = vrot.slane %v101_v29, 4 }
  0x4a   :  { %v84_v31 = vadd.f32 %v83_v28, %v82_v27 }
  0x4b   :  { %v103_v32 = vadd.f32 %v102_v30, %v101_v29 }
  0x4c   :  { %v85_v33 = vrot.slane %v84_v31, 2 }
  0x4d   :  { %v104_v34 = vrot.slane %v103_v32, 2 }
  0x4e   :  { %v86_v35 = vadd.f32 %v85_v33, %v84_v31 }
  0x4f   :  { %v105_v36 = vadd.f32 %v104_v34, %v103_v32 }
  0x50   :  { %v87_v37 = vrot.slane %v86_v35, 1 }
  0x51   :  { %v106_v38 = vrot.slane %v105_v36, 1 }
  0x52   :  { %v88_v39 = vadd.f32 %v87_v37, %v86_v35 }
  0x53   :  { %v107_v40 = vadd.f32 %v106_v38, %v105_v36 }
  0x54   :  { %186 = vrcp.f32 %v88_v39 }
  0x55   :  { %188 = vrcp.f32 %v107_v40 }
  0x5e   :  { %v187_v41 = vpop.eup %186 }
  0x5f   :  { %v189_v42 = vpop.eup %188  ;;  %v90_v43 = vmul.f32 %v187_v41, %v183_v25 }
  0x60   :  { %v109_v44 = vmul.f32 %v189_v42, %v185_v26 }
  0x62   :  { %v110_v45 = vsel %vm71_vm2, %v109_v44, -inf  ;;  %v121_v46 = vsub.f32 %v90_v43, %v109_v44 }
  0x63   :  { %v111_v47 = vrot.slane %v110_v45, 4 }
  0x64   :  { %v122_v48 = vmul.f32 %v121_v46, %v121_v46 }
  0x65   :  { %v112_v49 = vmax.f32 %v110_v45, %v111_v47 }
  0x66   :  { %v123_v50 = vsel %vm71_vm2, %v122_v48, 0.0 }
  0x67   :  { %v113_v51 = vrot.slane %v112_v49, 2  ;;  %v124_v52 = vrot.slane %v123_v50, 4 }
  0x69   :  { %v114_v53 = vmax.f32 %v112_v49, %v113_v51  ;;  %v125_v54 = vadd.f32 %v124_v52, %v123_v50 }
  0x6b   :  { %v115_v55 = vrot.slane %v114_v53, 1  ;;  %v126_v56 = vrot.slane %v125_v54, 2 }
  0x6d   :  { %v116_v57 = vmax.f32 %v114_v53, %v115_v55  ;;  %v127_v58 = vadd.f32 %v126_v56, %v125_v54 }
  0x6f   :  { %vm117_vm3 = vcmp.gt.f32.partialorder %v116_v57, 0.5  ;;  %v128_v59 = vrot.slane %v127_v58, 1 }
  0x70   :  { %vm118_vm4 = vmand %vm117_vm3, %vm64_vm1 }
  0x71   :  { %v129_v60 = vadd.f32 %v128_v59, %v127_v58  ;;  %v175_v61 = vsel %vm118_vm4, 1.0, %v264_v1 }
  0x73   :  { %v131_v62 = vmul.f32 0.125, %v129_v60 }
  0x75   :  { %v133_v63 = vmul.f32 %v175_v61, %v131_v62 }
  0x77   :  { %v135_v0 = vsel %vm134_vm5, %v133_v63, 0.0 }
  0x78   :  { %136 = vadd.xlane.f32.xlu0 %v135_v0 }
 0x105   :  { %v137_v3 = vpop.xlane.xlu0 %136 }
 0x106   :  { %v138_v4 = vrot.slane %v137_v3, 4 }
 0x108   :  { %v139_v5 = vadd.f32 %v138_v4, %v137_v3 }
 0x10a   :  { %v140_v6 = vrot.slane %v139_v5, 2 }
 0x10c   :  { %v141_v7 = vadd.f32 %v140_v6, %v139_v5 }
 0x10e   :  { %v142_v8 = vrot.slane %v141_v7, 1 }
 0x110   :  { %v143_v9 = vadd.f32 %v142_v8, %v141_v7 }
 0x112   :  { %176 = vpush %v143_v9 }
 0x143   :  { %s177_s1 = spop %176 }
 0x144   :  { %v145_v2 = vstv %s177_s1 }
 0x145   :  { %v146_v11 = vadd.f32 %v145_v2, %v132_v10 }
 0x147   :  { %148 = vst.msk [vmem:[#allocation7] sm:$0x1] %vm56_vm0, %v146_v11 }
 0x14e   :  { %v152_v1 = vld [vmem:[#allocation7] sm:$0x1] }
 0x14f   :  { %v153_v12 = vmul.f32 0.0625, %v152_v1 }
 0x151   :  { %154 = vst.msk [vmem:[#allocation7] sm:$0x1] %vm56_vm0, %v153_v12 }
 0x152   :  { %245 = shalt.err (!%p242_p6)
}
 0x153   :  { %s246_s10 = scalar_lea.hbm %s339_s2, 16 }
 0x154   :  { %p247_p7 = scmp.ne.s32.totalorder %s339_s2, %s246_s10  ;;  %p250_p8 = scmp.lt.u32.totalorder %s246_s10, %s339_s2 }
 0x156   :  { %p252_p9 = pnand %p250_p8, %p247_p7 }
 0x158   :  { %255 = shalt.err (!%p252_p9)
}
 0x159   :  { %164 = dma.vmem_to_hbm [thread:$0]  %s162_s5, 16, %s339_s2, [#allocation4]  }
 0x15a   :  { %260 = dma.done.wait [#allocation4], 16  }
 0x15b   :  { %261 = vsyncadd [#allocation4], 4294967280 }
 0x15c   :  { %168 = vsyncpa [#allocation3], 1 }
 0x15d   :  { %169 = vsyncpa [#allocation6], 1 }
 0x15e   :  { %170 = vsyncpa [#allocation4], 1 }

</bundles_post_ra>
